<compile_context>
chip_gen: v7x
topology: tpu7x:2x2x1
jax: 0.10.0
libtpu: 0.0.40
codegen_flags: <defaults>
</compile_context>

<pallas_src>
import functools

import jax
import jax.numpy as jnp
from jax import lax
from jax.experimental import pallas as pl
from jax.experimental.pallas import tpu as pltpu

LANE = 128           # one lane tile
GATE_TILE = LANE     # compact gate axis [r|z|n] (3*H lanes) padded to one tile


def _gru_seq_kernel(xs_ref, h0_ref, wx_ref, bx_ref, whh_ref, bhh_ref,
                    out_ref, gi_ref, *, H, T):
    """T-step GRU recurrence with all weights resident in VMEM.

    Layouts (G = 3*H gate lanes in PyTorch order [r|z|n], zero-padded to GATE_TILE):
      wx_ref  : (V, GATE_TILE)  fused input projection  W_x = W_lin @ W_ih   (f32)
      bx_ref  : (1, GATE_TILE)  fused input bias        b_x = b_lin @ W_ih + b_ih
      whh_ref : (H, GATE_TILE)  recurrent weights (bf16 on the optimized path)
      bhh_ref : (1, GATE_TILE)  recurrent bias (f32)
      gi_ref  : (T, GATE_TILE)  VMEM scratch for the precomputed input gates
    """
    # ---- preamble: batched input projection, off the serial critical path ----
    gi_ref[...] = (
        jnp.dot(xs_ref[...], wx_ref[...], preferred_element_type=jnp.float32)
        + bx_ref[...])

    # Loop-invariant operands hoisted out of the recurrence (loaded once).
    w_hh = whh_ref[...]                                # (H, GATE_TILE)
    b_hh = bhh_ref[...]                                # (1, GATE_TILE)

    def step(t, h):                                    # h: (1, H) f32
        gi = gi_ref[pl.ds(t, 1), :]                    # (1, GATE_TILE)
        # Single recurrent matmul per step; bf16 operands, f32 accumulation.
        gh = jnp.dot(h.astype(w_hh.dtype), w_hh,
                     preferred_element_type=jnp.float32) + b_hh
        # Static lane slices inside the single gate tile (VPU/XLU have slack).
        r = jax.nn.sigmoid(gi[:, 0:H] + gh[:, 0:H])
        z = jax.nn.sigmoid(gi[:, H:2 * H] + gh[:, H:2 * H])
        n = jnp.tanh(gi[:, 2 * H:3 * H] + r * gh[:, 2 * H:3 * H])
        h_new = (1.0 - z) * n + z * h                  # (1, H) f32
        out_ref[pl.ds(t, 1), :] = h_new
        return h_new

    # Full unroll only for small T; bounded unroll keeps instruction memory,
    # compile time and vreg live ranges in check for long sequences.
    unroll = T if T <= 16 else 8
    lax.fori_loop(0, T, step, h0_ref[...], unroll=unroll)


def pack_params(params, vector_size, hidden_size, recurrent_dtype=jnp.bfloat16):
    """Fuse Linear into the GRU input projection; compact-pad the gate axis."""
    V, H = vector_size, hidden_size
    G = 3 * H
    assert G <= GATE_TILE, "3*hidden_size must fit in one 128-lane tile"
    f32 = jnp.float32
    w_lin = params["w_lin"].astype(f32)     # (V, H)
    b_lin = params["b_lin"].astype(f32)     # (1, H)
    w_ih = params["w_ih"].astype(f32)       # (H, 3H)
    b_ih = params["b_ih"].astype(f32)       # (1, 3H)
    w_hh = params["w_hh"].astype(f32)       # (H, 3H)
    b_hh = params["b_hh"].astype(f32)       # (1, 3H)

    # Algebraic fusion of the Linear layer into the GRU input projection (f32).
    w_x = w_lin @ w_ih                      # (V, 3H)
    b_x = b_lin @ w_ih + b_ih               # (1, 3H)

    pad = lambda a: jnp.pad(a, ((0, 0), (0, GATE_TILE - G)))
    return (pad(w_x).astype(f32),                     # off-critical-path: keep f32
            pad(b_x).astype(f32),
            pad(w_hh).astype(recurrent_dtype),        # critical-path MXU operand
            pad(b_hh).astype(f32))


def encoder_embedding_input_rnn_sequence(word_embeds, hidden0, params,
                                         recurrent_dtype=jnp.bfloat16):
    """word_embeds: (T, V), hidden0: (1, 1, H) -> (outputs (T, 1, H), hidden (1, 1, H)).

    Equivalent to calling the PyTorch module's forward T times, feeding the
    hidden state back in (outputs[t] == hidden after step t).
    """
    T, V = word_embeds.shape
    H = hidden0.shape[-1]
    assert 3 * H <= GATE_TILE, "hidden_size too large for the compact gate tile"

    w_x, b_x, w_hh, b_hh = pack_params(params, V, H, recurrent_dtype)
    xs = word_embeds.astype(jnp.float32)
    h0 = hidden0.reshape(1, H).astype(jnp.float32)

    kernel = functools.partial(_gru_seq_kernel, H=H, T=T)
    full = lambda shape: pl.BlockSpec(shape, lambda: (0,) * len(shape))

    ys = pl.pallas_call(
        kernel,
        out_shape=jax.ShapeDtypeStruct((T, H), jnp.float32),
        grid=(),
        in_specs=[full(xs.shape), full(h0.shape), full(w_x.shape),
                  full(b_x.shape), full(w_hh.shape), full(b_hh.shape)],
        out_specs=full((T, H)),
        scratch_shapes=[pltpu.VMEM((T, GATE_TILE), jnp.float32)],
    )(xs, h0, w_x, b_x, w_hh, b_hh)

    outputs = ys.reshape(T, 1, H)
    hidden_new = outputs[-1].reshape(1, 1, H)
    return outputs, hidden_new


def encoder_embedding_input_rnn_forward(word_embed, hidden, params,
                                        recurrent_dtype=jnp.bfloat16):
    """Single step, matching the PyTorch module's forward: returns (output, hidden)."""
    V = word_embed.shape[-1]
    H = hidden.shape[-1]
    outputs, hidden_new = encoder_embedding_input_rnn_sequence(
        word_embed.reshape(1, V), hidden, params, recurrent_dtype)
    return outputs.reshape(1, 1, H), hidden_new


def _ref_step(x, h, params, H):
    """Pure-JAX single-step reference (unfused weights, all f32)."""
    x_lin = x @ params["w_lin"] + params["b_lin"]
    gi = x_lin @ params["w_ih"] + params["b_ih"]
    gh = h @ params["w_hh"] + params["b_hh"]
    i_r, i_z, i_n = gi[:, :H], gi[:, H:2 * H], gi[:, 2 * H:]
    h_r, h_z, h_n = gh[:, :H], gh[:, H:2 * H], gh[:, 2 * H:]
    r = jax.nn.sigmoid(i_r + h_r)
    z = jax.nn.sigmoid(i_z + h_z)
    n = jnp.tanh(i_n + r * h_n)
    return (1.0 - z) * n + z * h


def _ref_sequence(word_embeds, hidden0, params):
    T, V = word_embeds.shape
    H = hidden0.shape[-1]
    h = hidden0.reshape(1, H)
    outs = []
    for t in range(T):
        h = _ref_step(word_embeds[t].reshape(1, V), h, params, H)
        outs.append(h)
    return jnp.stack(outs).reshape(T, 1, H), h.reshape(1, 1, H)


def init_params(key, vector_size, hidden_size):
    """Deterministic synthetic parameters (PyTorch-like uniform init)."""
    kl_w, kl_b, ki_w, ki_b, kh_w, kh_b = jax.random.split(key, 6)
    s_lin = 1.0 / jnp.sqrt(vector_size)
    s_gru = 1.0 / jnp.sqrt(hidden_size)
    return {
        "w_lin": jax.random.uniform(kl_w, (vector_size, hidden_size), jnp.float32, -s_lin, s_lin),
        "b_lin": jax.random.uniform(kl_b, (1, hidden_size), jnp.float32, -s_lin, s_lin),
        "w_ih": jax.random.uniform(ki_w, (hidden_size, 3 * hidden_size), jnp.float32, -s_gru, s_gru),
        "b_ih": jax.random.uniform(ki_b, (1, 3 * hidden_size), jnp.float32, -s_gru, s_gru),
        "w_hh": jax.random.uniform(kh_w, (hidden_size, 3 * hidden_size), jnp.float32, -s_gru, s_gru),
        "b_hh": jax.random.uniform(kh_b, (1, 3 * hidden_size), jnp.float32, -s_gru, s_gru),
    }


if __name__ == "__main__":
    VECTOR_SIZE = 16   # word_vector.vector_size
    HIDDEN = 32        # hidden_size
    SEQ = 8            # recurrent steps run inside one kernel call

    key = jax.random.PRNGKey(0)
    k_params, k_embed = jax.random.split(key, 2)

    params = init_params(k_params, VECTOR_SIZE, HIDDEN)
    word_embeds = jax.random.normal(k_embed, (SEQ, VECTOR_SIZE), jnp.float32)
    hidden0 = jnp.zeros((1, 1, HIDDEN), jnp.float32)   # initHidden()

    ref_outputs, ref_hidden = _ref_sequence(word_embeds, hidden0, params)

    # f32 recurrent weights: tight parity check vs. the reference.
    out_f32, hid_f32 = encoder_embedding_input_rnn_sequence(
        word_embeds, hidden0, params, recurrent_dtype=jnp.float32)
    jax.block_until_ready(out_f32)
    jax.block_until_ready(hid_f32)
    assert out_f32.shape == (SEQ, 1, HIDDEN) and hid_f32.shape == (1, 1, HIDDEN)
    assert jnp.allclose(out_f32, ref_outputs, atol=1e-5), "f32 sequence mismatch vs reference"
    assert jnp.allclose(hid_f32, ref_hidden, atol=1e-5), "f32 final hidden mismatch vs reference"

    # bf16 recurrent weights (default optimized path): looser tolerance for bf16 drift.
    out_bf16, hid_bf16 = encoder_embedding_input_rnn_sequence(word_embeds, hidden0, params)
    jax.block_until_ready(out_bf16)
    jax.block_until_ready(hid_bf16)
    assert out_bf16.shape == (SEQ, 1, HIDDEN) and hid_bf16.shape == (1, 1, HIDDEN)
    assert jnp.allclose(out_bf16, ref_outputs, atol=2.5e-2), "bf16 sequence mismatch vs reference"
    assert jnp.allclose(hid_bf16, ref_hidden, atol=2.5e-2), "bf16 final hidden mismatch vs reference"

    # Single-step path (matches the PyTorch module's forward signature/semantics).
    out1, hid1 = encoder_embedding_input_rnn_forward(word_embeds[0], hidden0, params)
    jax.block_until_ready(out1)
    ref1 = _ref_step(word_embeds[0].reshape(1, VECTOR_SIZE),
                     hidden0.reshape(1, HIDDEN), params, HIDDEN).reshape(1, 1, HIDDEN)
    assert out1.shape == (1, 1, HIDDEN) and hid1.shape == (1, 1, HIDDEN)
    assert jnp.allclose(out1, ref1, atol=1e-4), "single-step output mismatch vs reference"
    assert jnp.allclose(hid1, ref1, atol=1e-4), "single-step hidden mismatch vs reference"

    print("KERNEL_OK")
</pallas_src>

<mosaic_0001>
module attributes {stable_mosaic.version = 11 : i64} {
  func.func @_gru_seq_kernel(%arg0: memref<8x16xf32, #tpu.memory_space<vmem>>, %arg1: memref<1x32xf32, #tpu.memory_space<vmem>>, %arg2: memref<16x128xf32, #tpu.memory_space<vmem>>, %arg3: memref<1x128xf32, #tpu.memory_space<vmem>>, %arg4: memref<32x128xf32, #tpu.memory_space<vmem>>, %arg5: memref<1x128xf32, #tpu.memory_space<vmem>>, %arg6: memref<8x32xf32, #tpu.memory_space<vmem>>, %arg7: memref<8x128xf32, #tpu.memory_space<vmem>>) attributes {dimension_semantics = [], scalar_prefetch = 0 : i64, scratch_operands = 1 : i64, tpu.core_type = #tpu.core_type<tc>} {
    %c0 = arith.constant 0 : index
    %c0_0 = arith.constant 0 : index
    %0 = vector.load %arg0[%c0, %c0_0] : memref<8x16xf32, #tpu.memory_space<vmem>>, vector<8x16xf32>
    %c0_1 = arith.constant 0 : index
    %c0_2 = arith.constant 0 : index
    %1 = vector.load %arg2[%c0_1, %c0_2] : memref<16x128xf32, #tpu.memory_space<vmem>>, vector<16x128xf32>
    %cst = arith.constant dense<0.000000e+00> : vector<8x128xf32>
    %2 = tpu.matmul %0, %1, %cst {dimension_numbers = #tpu.dot_dimension_numbers<[1], [0], [0], [1], [0, 0, 1, 1], [], []>} : vector<8x16xf32>, vector<16x128xf32>, vector<8x128xf32> -> vector<8x128xf32>
    %c0_3 = arith.constant 0 : index
    %c0_4 = arith.constant 0 : index
    %3 = vector.load %arg3[%c0_3, %c0_4] : memref<1x128xf32, #tpu.memory_space<vmem>>, vector<1x128xf32>
    %4 = vector.broadcast %3 : vector<1x128xf32> to vector<8x128xf32>
    %5 = arith.addf %2, %4 : vector<8x128xf32>
    %c0_5 = arith.constant 0 : index
    %c0_6 = arith.constant 0 : index
    %6 = vector.load %arg7[%c0_5, %c0_6] : memref<8x128xf32, #tpu.memory_space<vmem>>, vector<8x128xf32>
    tpu.vector_store %arg7[%c0_5, %c0_6], %5 {strides = array<i32>} : memref<8x128xf32, #tpu.memory_space<vmem>>, vector<8x128xf32>,
    %c0_7 = arith.constant 0 : index
    %c0_8 = arith.constant 0 : index
    %7 = vector.load %arg4[%c0_7, %c0_8] : memref<32x128xf32, #tpu.memory_space<vmem>>, vector<32x128xf32>
    %c0_9 = arith.constant 0 : index
    %c0_10 = arith.constant 0 : index
    %8 = vector.load %arg5[%c0_9, %c0_10] : memref<1x128xf32, #tpu.memory_space<vmem>>, vector<1x128xf32>
    %c0_11 = arith.constant 0 : index
    %c0_12 = arith.constant 0 : index
    %9 = vector.load %arg1[%c0_11, %c0_12] : memref<1x32xf32, #tpu.memory_space<vmem>>, vector<1x32xf32>
    %c0_i32 = arith.constant 0 : i32
    %10 = arith.index_cast %c0_i32 : i32 to index
    %c0_13 = arith.constant 0 : index
    %11 = vector.load %arg7[%10, %c0_13] : memref<8x128xf32, #tpu.memory_space<vmem>>, vector<1x128xf32>
    %cst_14 = arith.constant dense<0.000000e+00> : vector<1x128xf32>
    %12 = tpu.matmul %9, %7, %cst_14 {dimension_numbers = #tpu.dot_dimension_numbers<[1], [0], [0], [1], [0, 0, 1, 1], [], []>} : vector<1x32xf32>, vector<32x128xf32>, vector<1x128xf32> -> vector<1x128xf32>
    %13 = arith.addf %12, %8 : vector<1x128xf32>
    %14 = vector.extract_strided_slice %11 {offsets = [0, 0], sizes = [1, 32], strides = [1, 1]} : vector<1x128xf32> to vector<1x32xf32>
    %15 = vector.extract_strided_slice %13 {offsets = [0, 0], sizes = [1, 32], strides = [1, 1]} : vector<1x128xf32> to vector<1x32xf32>
    %16 = arith.addf %14, %15 : vector<1x32xf32>
    %17 = arith.negf %16 : vector<1x32xf32>
    %18 = math.exp %17 : vector<1x32xf32>
    %cst_15 = arith.constant 1.000000e+00 : f32
    %19 = vector.broadcast %cst_15 : f32 to vector<1x32xf32>
    %20 = arith.addf %19, %18 : vector<1x32xf32>
    %21 = arith.divf %19, %20 : vector<1x32xf32>
    %22 = vector.extract_strided_slice %11 {offsets = [0, 32], sizes = [1, 32], strides = [1, 1]} : vector<1x128xf32> to vector<1x32xf32>
    %23 = vector.extract_strided_slice %13 {offsets = [0, 32], sizes = [1, 32], strides = [1, 1]} : vector<1x128xf32> to vector<1x32xf32>
    %24 = arith.addf %22, %23 : vector<1x32xf32>
    %25 = arith.negf %24 : vector<1x32xf32>
    %26 = math.exp %25 : vector<1x32xf32>
    %cst_16 = arith.constant 1.000000e+00 : f32
    %27 = vector.broadcast %cst_16 : f32 to vector<1x32xf32>
    %28 = arith.addf %27, %26 : vector<1x32xf32>
    %29 = arith.divf %27, %28 : vector<1x32xf32>
    %30 = vector.extract_strided_slice %11 {offsets = [0, 64], sizes = [1, 32], strides = [1, 1]} : vector<1x128xf32> to vector<1x32xf32>
    %31 = vector.extract_strided_slice %13 {offsets = [0, 64], sizes = [1, 32], strides = [1, 1]} : vector<1x128xf32> to vector<1x32xf32>
    %32 = arith.mulf %21, %31 : vector<1x32xf32>
    %33 = arith.addf %30, %32 : vector<1x32xf32>
    %34 = math.tanh %33 : vector<1x32xf32>
    %cst_17 = arith.constant 1.000000e+00 : f32
    %35 = vector.broadcast %cst_17 : f32 to vector<1x32xf32>
    %36 = arith.subf %35, %29 : vector<1x32xf32>
    %37 = arith.mulf %36, %34 : vector<1x32xf32>
    %38 = arith.mulf %29, %9 : vector<1x32xf32>
    %39 = arith.addf %37, %38 : vector<1x32xf32>
    %40 = arith.index_cast %c0_i32 : i32 to index
    %c0_18 = arith.constant 0 : index
    %41 = vector.load %arg6[%40, %c0_18] : memref<8x32xf32, #tpu.memory_space<vmem>>, vector<1x32xf32>
    tpu.vector_store %arg6[%40, %c0_18], %39 {strides = array<i32>} : memref<8x32xf32, #tpu.memory_space<vmem>>, vector<1x32xf32>,
    %c1_i32 = arith.constant 1 : i32
    %42 = arith.index_cast %c1_i32 : i32 to index
    %c0_19 = arith.constant 0 : index
    %43 = vector.load %arg7[%42, %c0_19] : memref<8x128xf32, #tpu.memory_space<vmem>>, vector<1x128xf32>
    %cst_20 = arith.constant dense<0.000000e+00> : vector<1x128xf32>
    %44 = tpu.matmul %39, %7, %cst_20 {dimension_numbers = #tpu.dot_dimension_numbers<[1], [0], [0], [1], [0, 0, 1, 1], [], []>} : vector<1x32xf32>, vector<32x128xf32>, vector<1x128xf32> -> vector<1x128xf32>
    %45 = arith.addf %44, %8 : vector<1x128xf32>
    %46 = vector.extract_strided_slice %43 {offsets = [0, 0], sizes = [1, 32], strides = [1, 1]} : vector<1x128xf32> to vector<1x32xf32>
    %47 = vector.extract_strided_slice %45 {offsets = [0, 0], sizes = [1, 32], strides = [1, 1]} : vector<1x128xf32> to vector<1x32xf32>
    %48 = arith.addf %46, %47 : vector<1x32xf32>
    %49 = arith.negf %48 : vector<1x32xf32>
    %50 = math.exp %49 : vector<1x32xf32>
    %cst_21 = arith.constant 1.000000e+00 : f32
    %51 = vector.broadcast %cst_21 : f32 to vector<1x32xf32>
    %52 = arith.addf %51, %50 : vector<1x32xf32>
    %53 = arith.divf %51, %52 : vector<1x32xf32>
    %54 = vector.extract_strided_slice %43 {offsets = [0, 32], sizes = [1, 32], strides = [1, 1]} : vector<1x128xf32> to vector<1x32xf32>
    %55 = vector.extract_strided_slice %45 {offsets = [0, 32], sizes = [1, 32], strides = [1, 1]} : vector<1x128xf32> to vector<1x32xf32>
    %56 = arith.addf %54, %55 : vector<1x32xf32>
    %57 = arith.negf %56 : vector<1x32xf32>
    %58 = math.exp %57 : vector<1x32xf32>
    %cst_22 = arith.constant 1.000000e+00 : f32
    %59 = vector.broadcast %cst_22 : f32 to vector<1x32xf32>
    %60 = arith.addf %59, %58 : vector<1x32xf32>
    %61 = arith.divf %59, %60 : vector<1x32xf32>
    %62 = vector.extract_strided_slice %43 {offsets = [0, 64], sizes = [1, 32], strides = [1, 1]} : vector<1x128xf32> to vector<1x32xf32>
    %63 = vector.extract_strided_slice %45 {offsets = [0, 64], sizes = [1, 32], strides = [1, 1]} : vector<1x128xf32> to vector<1x32xf32>
    %64 = arith.mulf %53, %63 : vector<1x32xf32>
    %65 = arith.addf %62, %64 : vector<1x32xf32>
    %66 = math.tanh %65 : vector<1x32xf32>
    %cst_23 = arith.constant 1.000000e+00 : f32
    %67 = vector.broadcast %cst_23 : f32 to vector<1x32xf32>
    %68 = arith.subf %67, %61 : vector<1x32xf32>
    %69 = arith.mulf %68, %66 : vector<1x32xf32>
    %70 = arith.mulf %61, %39 : vector<1x32xf32>
    %71 = arith.addf %69, %70 : vector<1x32xf32>
    %72 = arith.index_cast %c1_i32 : i32 to index
    %c0_24 = arith.constant 0 : index
    %73 = vector.load %arg6[%72, %c0_24] : memref<8x32xf32, #tpu.memory_space<vmem>>, vector<1x32xf32>
    tpu.vector_store %arg6[%72, %c0_24], %71 {strides = array<i32>} : memref<8x32xf32, #tpu.memory_space<vmem>>, vector<1x32xf32>,
    %c2_i32 = arith.constant 2 : i32
    %74 = arith.index_cast %c2_i32 : i32 to index
    %c0_25 = arith.constant 0 : index
    %75 = vector.load %arg7[%74, %c0_25] : memref<8x128xf32, #tpu.memory_space<vmem>>, vector<1x128xf32>
    %cst_26 = arith.constant dense<0.000000e+00> : vector<1x128xf32>
    %76 = tpu.matmul %71, %7, %cst_26 {dimension_numbers = #tpu.dot_dimension_numbers<[1], [0], [0], [1], [0, 0, 1, 1], [], []>} : vector<1x32xf32>, vector<32x128xf32>, vector<1x128xf32> -> vector<1x128xf32>
    %77 = arith.addf %76, %8 : vector<1x128xf32>
    %78 = vector.extract_strided_slice %75 {offsets = [0, 0], sizes = [1, 32], strides = [1, 1]} : vector<1x128xf32> to vector<1x32xf32>
    %79 = vector.extract_strided_slice %77 {offsets = [0, 0], sizes = [1, 32], strides = [1, 1]} : vector<1x128xf32> to vector<1x32xf32>
    %80 = arith.addf %78, %79 : vector<1x32xf32>
    %81 = arith.negf %80 : vector<1x32xf32>
    %82 = math.exp %81 : vector<1x32xf32>
    %cst_27 = arith.constant 1.000000e+00 : f32
    %83 = vector.broadcast %cst_27 : f32 to vector<1x32xf32>
    %84 = arith.addf %83, %82 : vector<1x32xf32>
    %85 = arith.divf %83, %84 : vector<1x32xf32>
    %86 = vector.extract_strided_slice %75 {offsets = [0, 32], sizes = [1, 32], strides = [1, 1]} : vector<1x128xf32> to vector<1x32xf32>
    %87 = vector.extract_strided_slice %77 {offsets = [0, 32], sizes = [1, 32], strides = [1, 1]} : vector<1x128xf32> to vector<1x32xf32>
    %88 = arith.addf %86, %87 : vector<1x32xf32>
    %89 = arith.negf %88 : vector<1x32xf32>
    %90 = math.exp %89 : vector<1x32xf32>
    %cst_28 = arith.constant 1.000000e+00 : f32
    %91 = vector.broadcast %cst_28 : f32 to vector<1x32xf32>
    %92 = arith.addf %91, %90 : vector<1x32xf32>
    %93 = arith.divf %91, %92 : vector<1x32xf32>
    %94 = vector.extract_strided_slice %75 {offsets = [0, 64], sizes = [1, 32], strides = [1, 1]} : vector<1x128xf32> to vector<1x32xf32>
    %95 = vector.extract_strided_slice %77 {offsets = [0, 64], sizes = [1, 32], strides = [1, 1]} : vector<1x128xf32> to vector<1x32xf32>
    %96 = arith.mulf %85, %95 : vector<1x32xf32>
    %97 = arith.addf %94, %96 : vector<1x32xf32>
    %98 = math.tanh %97 : vector<1x32xf32>
    %cst_29 = arith.constant 1.000000e+00 : f32
    %99 = vector.broadcast %cst_29 : f32 to vector<1x32xf32>
    %100 = arith.subf %99, %93 : vector<1x32xf32>
    %101 = arith.mulf %100, %98 : vector<1x32xf32>
    %102 = arith.mulf %93, %71 : vector<1x32xf32>
    %103 = arith.addf %101, %102 : vector<1x32xf32>
    %104 = arith.index_cast %c2_i32 : i32 to index
    %c0_30 = arith.constant 0 : index
    %105 = vector.load %arg6[%104, %c0_30] : memref<8x32xf32, #tpu.memory_space<vmem>>, vector<1x32xf32>
    tpu.vector_store %arg6[%104, %c0_30], %103 {strides = array<i32>} : memref<8x32xf32, #tpu.memory_space<vmem>>, vector<1x32xf32>,
    %c3_i32 = arith.constant 3 : i32
    %106 = arith.index_cast %c3_i32 : i32 to index
    %c0_31 = arith.constant 0 : index
    %107 = vector.load %arg7[%106, %c0_31] : memref<8x128xf32, #tpu.memory_space<vmem>>, vector<1x128xf32>
    %cst_32 = arith.constant dense<0.000000e+00> : vector<1x128xf32>
    %108 = tpu.matmul %103, %7, %cst_32 {dimension_numbers = #tpu.dot_dimension_numbers<[1], [0], [0], [1], [0, 0, 1, 1], [], []>} : vector<1x32xf32>, vector<32x128xf32>, vector<1x128xf32> -> vector<1x128xf32>
    %109 = arith.addf %108, %8 : vector<1x128xf32>
    %110 = vector.extract_strided_slice %107 {offsets = [0, 0], sizes = [1, 32], strides = [1, 1]} : vector<1x128xf32> to vector<1x32xf32>
    %111 = vector.extract_strided_slice %109 {offsets = [0, 0], sizes = [1, 32], strides = [1, 1]} : vector<1x128xf32> to vector<1x32xf32>
    %112 = arith.addf %110, %111 : vector<1x32xf32>
    %113 = arith.negf %112 : vector<1x32xf32>
    %114 = math.exp %113 : vector<1x32xf32>
    %cst_33 = arith.constant 1.000000e+00 : f32
    %115 = vector.broadcast %cst_33 : f32 to vector<1x32xf32>
    %116 = arith.addf %115, %114 : vector<1x32xf32>
    %117 = arith.divf %115, %116 : vector<1x32xf32>
    %118 = vector.extract_strided_slice %107 {offsets = [0, 32], sizes = [1, 32], strides = [1, 1]} : vector<1x128xf32> to vector<1x32xf32>
    %119 = vector.extract_strided_slice %109 {offsets = [0, 32], sizes = [1, 32], strides = [1, 1]} : vector<1x128xf32> to vector<1x32xf32>
    %120 = arith.addf %118, %119 : vector<1x32xf32>
    %121 = arith.negf %120 : vector<1x32xf32>
    %122 = math.exp %121 : vector<1x32xf32>
    %cst_34 = arith.constant 1.000000e+00 : f32
    %123 = vector.broadcast %cst_34 : f32 to vector<1x32xf32>
    %124 = arith.addf %123, %122 : vector<1x32xf32>
    %125 = arith.divf %123, %124 : vector<1x32xf32>
    %126 = vector.extract_strided_slice %107 {offsets = [0, 64], sizes = [1, 32], strides = [1, 1]} : vector<1x128xf32> to vector<1x32xf32>
    %127 = vector.extract_strided_slice %109 {offsets = [0, 64], sizes = [1, 32], strides = [1, 1]} : vector<1x128xf32> to vector<1x32xf32>
    %128 = arith.mulf %117, %127 : vector<1x32xf32>
    %129 = arith.addf %126, %128 : vector<1x32xf32>
    %130 = math.tanh %129 : vector<1x32xf32>
    %cst_35 = arith.constant 1.000000e+00 : f32
    %131 = vector.broadcast %cst_35 : f32 to vector<1x32xf32>
    %132 = arith.subf %131, %125 : vector<1x32xf32>
    %133 = arith.mulf %132, %130 : vector<1x32xf32>
    %134 = arith.mulf %125, %103 : vector<1x32xf32>
    %135 = arith.addf %133, %134 : vector<1x32xf32>
    %136 = arith.index_cast %c3_i32 : i32 to index
    %c0_36 = arith.constant 0 : index
    %137 = vector.load %arg6[%136, %c0_36] : memref<8x32xf32, #tpu.memory_space<vmem>>, vector<1x32xf32>
    tpu.vector_store %arg6[%136, %c0_36], %135 {strides = array<i32>} : memref<8x32xf32, #tpu.memory_space<vmem>>, vector<1x32xf32>,
    %c4_i32 = arith.constant 4 : i32
    %138 = arith.index_cast %c4_i32 : i32 to index
    %c0_37 = arith.constant 0 : index
    %139 = vector.load %arg7[%138, %c0_37] : memref<8x128xf32, #tpu.memory_space<vmem>>, vector<1x128xf32>
    %cst_38 = arith.constant dense<0.000000e+00> : vector<1x128xf32>
    %140 = tpu.matmul %135, %7, %cst_38 {dimension_numbers = #tpu.dot_dimension_numbers<[1], [0], [0], [1], [0, 0, 1, 1], [], []>} : vector<1x32xf32>, vector<32x128xf32>, vector<1x128xf32> -> vector<1x128xf32>
    %141 = arith.addf %140, %8 : vector<1x128xf32>
    %142 = vector.extract_strided_slice %139 {offsets = [0, 0], sizes = [1, 32], strides = [1, 1]} : vector<1x128xf32> to vector<1x32xf32>
    %143 = vector.extract_strided_slice %141 {offsets = [0, 0], sizes = [1, 32], strides = [1, 1]} : vector<1x128xf32> to vector<1x32xf32>
    %144 = arith.addf %142, %143 : vector<1x32xf32>
    %145 = arith.negf %144 : vector<1x32xf32>
    %146 = math.exp %145 : vector<1x32xf32>
    %cst_39 = arith.constant 1.000000e+00 : f32
    %147 = vector.broadcast %cst_39 : f32 to vector<1x32xf32>
    %148 = arith.addf %147, %146 : vector<1x32xf32>
    %149 = arith.divf %147, %148 : vector<1x32xf32>
    %150 = vector.extract_strided_slice %139 {offsets = [0, 32], sizes = [1, 32], strides = [1, 1]} : vector<1x128xf32> to vector<1x32xf32>
    %151 = vector.extract_strided_slice %141 {offsets = [0, 32], sizes = [1, 32], strides = [1, 1]} : vector<1x128xf32> to vector<1x32xf32>
    %152 = arith.addf %150, %151 : vector<1x32xf32>
    %153 = arith.negf %152 : vector<1x32xf32>
    %154 = math.exp %153 : vector<1x32xf32>
    %cst_40 = arith.constant 1.000000e+00 : f32
    %155 = vector.broadcast %cst_40 : f32 to vector<1x32xf32>
    %156 = arith.addf %155, %154 : vector<1x32xf32>
    %157 = arith.divf %155, %156 : vector<1x32xf32>
    %158 = vector.extract_strided_slice %139 {offsets = [0, 64], sizes = [1, 32], strides = [1, 1]} : vector<1x128xf32> to vector<1x32xf32>
    %159 = vector.extract_strided_slice %141 {offsets = [0, 64], sizes = [1, 32], strides = [1, 1]} : vector<1x128xf32> to vector<1x32xf32>
    %160 = arith.mulf %149, %159 : vector<1x32xf32>
    %161 = arith.addf %158, %160 : vector<1x32xf32>
    %162 = math.tanh %161 : vector<1x32xf32>
    %cst_41 = arith.constant 1.000000e+00 : f32
    %163 = vector.broadcast %cst_41 : f32 to vector<1x32xf32>
    %164 = arith.subf %163, %157 : vector<1x32xf32>
    %165 = arith.mulf %164, %162 : vector<1x32xf32>
    %166 = arith.mulf %157, %135 : vector<1x32xf32>
    %167 = arith.addf %165, %166 : vector<1x32xf32>
    %168 = arith.index_cast %c4_i32 : i32 to index
    %c0_42 = arith.constant 0 : index
    %169 = vector.load %arg6[%168, %c0_42] : memref<8x32xf32, #tpu.memory_space<vmem>>, vector<1x32xf32>
    tpu.vector_store %arg6[%168, %c0_42], %167 {strides = array<i32>} : memref<8x32xf32, #tpu.memory_space<vmem>>, vector<1x32xf32>,
    %c5_i32 = arith.constant 5 : i32
    %170 = arith.index_cast %c5_i32 : i32 to index
    %c0_43 = arith.constant 0 : index
    %171 = vector.load %arg7[%170, %c0_43] : memref<8x128xf32, #tpu.memory_space<vmem>>, vector<1x128xf32>
    %cst_44 = arith.constant dense<0.000000e+00> : vector<1x128xf32>
    %172 = tpu.matmul %167, %7, %cst_44 {dimension_numbers = #tpu.dot_dimension_numbers<[1], [0], [0], [1], [0, 0, 1, 1], [], []>} : vector<1x32xf32>, vector<32x128xf32>, vector<1x128xf32> -> vector<1x128xf32>
    %173 = arith.addf %172, %8 : vector<1x128xf32>
    %174 = vector.extract_strided_slice %171 {offsets = [0, 0], sizes = [1, 32], strides = [1, 1]} : vector<1x128xf32> to vector<1x32xf32>
    %175 = vector.extract_strided_slice %173 {offsets = [0, 0], sizes = [1, 32], strides = [1, 1]} : vector<1x128xf32> to vector<1x32xf32>
    %176 = arith.addf %174, %175 : vector<1x32xf32>
    %177 = arith.negf %176 : vector<1x32xf32>
    %178 = math.exp %177 : vector<1x32xf32>
    %cst_45 = arith.constant 1.000000e+00 : f32
    %179 = vector.broadcast %cst_45 : f32 to vector<1x32xf32>
    %180 = arith.addf %179, %178 : vector<1x32xf32>
    %181 = arith.divf %179, %180 : vector<1x32xf32>
    %182 = vector.extract_strided_slice %171 {offsets = [0, 32], sizes = [1, 32], strides = [1, 1]} : vector<1x128xf32> to vector<1x32xf32>
    %183 = vector.extract_strided_slice %173 {offsets = [0, 32], sizes = [1, 32], strides = [1, 1]} : vector<1x128xf32> to vector<1x32xf32>
    %184 = arith.addf %182, %183 : vector<1x32xf32>
    %185 = arith.negf %184 : vector<1x32xf32>
    %186 = math.exp %185 : vector<1x32xf32>
    %cst_46 = arith.constant 1.000000e+00 : f32
    %187 = vector.broadcast %cst_46 : f32 to vector<1x32xf32>
    %188 = arith.addf %187, %186 : vector<1x32xf32>
    %189 = arith.divf %187, %188 : vector<1x32xf32>
    %190 = vector.extract_strided_slice %171 {offsets = [0, 64], sizes = [1, 32], strides = [1, 1]} : vector<1x128xf32> to vector<1x32xf32>
    %191 = vector.extract_strided_slice %173 {offsets = [0, 64], sizes = [1, 32], strides = [1, 1]} : vector<1x128xf32> to vector<1x32xf32>
    %192 = arith.mulf %181, %191 : vector<1x32xf32>
    %193 = arith.addf %190, %192 : vector<1x32xf32>
    %194 = math.tanh %193 : vector<1x32xf32>
    %cst_47 = arith.constant 1.000000e+00 : f32
    %195 = vector.broadcast %cst_47 : f32 to vector<1x32xf32>
    %196 = arith.subf %195, %189 : vector<1x32xf32>
    %197 = arith.mulf %196, %194 : vector<1x32xf32>
    %198 = arith.mulf %189, %167 : vector<1x32xf32>
    %199 = arith.addf %197, %198 : vector<1x32xf32>
    %200 = arith.index_cast %c5_i32 : i32 to index
    %c0_48 = arith.constant 0 : index
    %201 = vector.load %arg6[%200, %c0_48] : memref<8x32xf32, #tpu.memory_space<vmem>>, vector<1x32xf32>
    tpu.vector_store %arg6[%200, %c0_48], %199 {strides = array<i32>} : memref<8x32xf32, #tpu.memory_space<vmem>>, vector<1x32xf32>,
    %c6_i32 = arith.constant 6 : i32
    %202 = arith.index_cast %c6_i32 : i32 to index
    %c0_49 = arith.constant 0 : index
    %203 = vector.load %arg7[%202, %c0_49] : memref<8x128xf32, #tpu.memory_space<vmem>>, vector<1x128xf32>
    %cst_50 = arith.constant dense<0.000000e+00> : vector<1x128xf32>
    %204 = tpu.matmul %199, %7, %cst_50 {dimension_numbers = #tpu.dot_dimension_numbers<[1], [0], [0], [1], [0, 0, 1, 1], [], []>} : vector<1x32xf32>, vector<32x128xf32>, vector<1x128xf32> -> vector<1x128xf32>
    %205 = arith.addf %204, %8 : vector<1x128xf32>
    %206 = vector.extract_strided_slice %203 {offsets = [0, 0], sizes = [1, 32], strides = [1, 1]} : vector<1x128xf32> to vector<1x32xf32>
    %207 = vector.extract_strided_slice %205 {offsets = [0, 0], sizes = [1, 32], strides = [1, 1]} : vector<1x128xf32> to vector<1x32xf32>
    %208 = arith.addf %206, %207 : vector<1x32xf32>
    %209 = arith.negf %208 : vector<1x32xf32>
    %210 = math.exp %209 : vector<1x32xf32>
    %cst_51 = arith.constant 1.000000e+00 : f32
    %211 = vector.broadcast %cst_51 : f32 to vector<1x32xf32>
    %212 = arith.addf %211, %210 : vector<1x32xf32>
    %213 = arith.divf %211, %212 : vector<1x32xf32>
    %214 = vector.extract_strided_slice %203 {offsets = [0, 32], sizes = [1, 32], strides = [1, 1]} : vector<1x128xf32> to vector<1x32xf32>
    %215 = vector.extract_strided_slice %205 {offsets = [0, 32], sizes = [1, 32], strides = [1, 1]} : vector<1x128xf32> to vector<1x32xf32>
    %216 = arith.addf %214, %215 : vector<1x32xf32>
    %217 = arith.negf %216 : vector<1x32xf32>
    %218 = math.exp %217 : vector<1x32xf32>
    %cst_52 = arith.constant 1.000000e+00 : f32
    %219 = vector.broadcast %cst_52 : f32 to vector<1x32xf32>
    %220 = arith.addf %219, %218 : vector<1x32xf32>
    %221 = arith.divf %219, %220 : vector<1x32xf32>
    %222 = vector.extract_strided_slice %203 {offsets = [0, 64], sizes = [1, 32], strides = [1, 1]} : vector<1x128xf32> to vector<1x32xf32>
    %223 = vector.extract_strided_slice %205 {offsets = [0, 64], sizes = [1, 32], strides = [1, 1]} : vector<1x128xf32> to vector<1x32xf32>
    %224 = arith.mulf %213, %223 : vector<1x32xf32>
    %225 = arith.addf %222, %224 : vector<1x32xf32>
    %226 = math.tanh %225 : vector<1x32xf32>
    %cst_53 = arith.constant 1.000000e+00 : f32
    %227 = vector.broadcast %cst_53 : f32 to vector<1x32xf32>
    %228 = arith.subf %227, %221 : vector<1x32xf32>
    %229 = arith.mulf %228, %226 : vector<1x32xf32>
    %230 = arith.mulf %221, %199 : vector<1x32xf32>
    %231 = arith.addf %229, %230 : vector<1x32xf32>
    %232 = arith.index_cast %c6_i32 : i32 to index
    %c0_54 = arith.constant 0 : index
    %233 = vector.load %arg6[%232, %c0_54] : memref<8x32xf32, #tpu.memory_space<vmem>>, vector<1x32xf32>
    tpu.vector_store %arg6[%232, %c0_54], %231 {strides = array<i32>} : memref<8x32xf32, #tpu.memory_space<vmem>>, vector<1x32xf32>,
    %c7_i32 = arith.constant 7 : i32
    %234 = arith.index_cast %c7_i32 : i32 to index
    %c0_55 = arith.constant 0 : index
    %235 = vector.load %arg7[%234, %c0_55] : memref<8x128xf32, #tpu.memory_space<vmem>>, vector<1x128xf32>
    %cst_56 = arith.constant dense<0.000000e+00> : vector<1x128xf32>
    %236 = tpu.matmul %231, %7, %cst_56 {dimension_numbers = #tpu.dot_dimension_numbers<[1], [0], [0], [1], [0, 0, 1, 1], [], []>} : vector<1x32xf32>, vector<32x128xf32>, vector<1x128xf32> -> vector<1x128xf32>
    %237 = arith.addf %236, %8 : vector<1x128xf32>
    %238 = vector.extract_strided_slice %235 {offsets = [0, 0], sizes = [1, 32], strides = [1, 1]} : vector<1x128xf32> to vector<1x32xf32>
    %239 = vector.extract_strided_slice %237 {offsets = [0, 0], sizes = [1, 32], strides = [1, 1]} : vector<1x128xf32> to vector<1x32xf32>
    %240 = arith.addf %238, %239 : vector<1x32xf32>
    %241 = arith.negf %240 : vector<1x32xf32>
    %242 = math.exp %241 : vector<1x32xf32>
    %cst_57 = arith.constant 1.000000e+00 : f32
    %243 = vector.broadcast %cst_57 : f32 to vector<1x32xf32>
    %244 = arith.addf %243, %242 : vector<1x32xf32>
    %245 = arith.divf %243, %244 : vector<1x32xf32>
    %246 = vector.extract_strided_slice %235 {offsets = [0, 32], sizes = [1, 32], strides = [1, 1]} : vector<1x128xf32> to vector<1x32xf32>
    %247 = vector.extract_strided_slice %237 {offsets = [0, 32], sizes = [1, 32], strides = [1, 1]} : vector<1x128xf32> to vector<1x32xf32>
    %248 = arith.addf %246, %247 : vector<1x32xf32>
    %249 = arith.negf %248 : vector<1x32xf32>
    %250 = math.exp %249 : vector<1x32xf32>
    %cst_58 = arith.constant 1.000000e+00 : f32
    %251 = vector.broadcast %cst_58 : f32 to vector<1x32xf32>
    %252 = arith.addf %251, %250 : vector<1x32xf32>
    %253 = arith.divf %251, %252 : vector<1x32xf32>
    %254 = vector.extract_strided_slice %235 {offsets = [0, 64], sizes = [1, 32], strides = [1, 1]} : vector<1x128xf32> to vector<1x32xf32>
    %255 = vector.extract_strided_slice %237 {offsets = [0, 64], sizes = [1, 32], strides = [1, 1]} : vector<1x128xf32> to vector<1x32xf32>
    %256 = arith.mulf %245, %255 : vector<1x32xf32>
    %257 = arith.addf %254, %256 : vector<1x32xf32>
    %258 = math.tanh %257 : vector<1x32xf32>
    %cst_59 = arith.constant 1.000000e+00 : f32
    %259 = vector.broadcast %cst_59 : f32 to vector<1x32xf32>
    %260 = arith.subf %259, %253 : vector<1x32xf32>
    %261 = arith.mulf %260, %258 : vector<1x32xf32>
    %262 = arith.mulf %253, %231 : vector<1x32xf32>
    %263 = arith.addf %261, %262 : vector<1x32xf32>
    %264 = arith.index_cast %c7_i32 : i32 to index
    %c0_60 = arith.constant 0 : index
    %265 = vector.load %arg6[%264, %c0_60] : memref<8x32xf32, #tpu.memory_space<vmem>>, vector<1x32xf32>
    tpu.vector_store %arg6[%264, %c0_60], %263 {strides = array<i32>} : memref<8x32xf32, #tpu.memory_space<vmem>>, vector<1x32xf32>,
    %c8_i32 = arith.constant 8 : i32
    return
  }
}

</mosaic_0001>

<bundles_post_ra>
// kernel: tpu_custom_call.1
= control target key start
LH: loop header
LB: loop body
LE: loop exit
PB: predicated region body
PF: predicated region fallthrough
CT: control target
= control target key end

     0   :  { %11 = vsyncpa [#allocation4], 0  ;;  %s1596_s0 = inlined_call_operand.hbm [shape: f32[8,16], index: 0, kind: input, shape index: {}]   ;;  %s1597_s1 = inlined_call_operand.vmem [shape: f32[1,32], index: 1, kind: input, shape index: {}]   ;;  %s1598_s2 = inlined_call_operand.hbm [shape: f32[16,128], index: 2, kind: input, shape index: {}]   ;;  %s1599_s3 = inlined_call_operand.vmem [shape: f32[1,128], index: 3, kind: input, shape index: {}]   ;;  %s1600_s4 = inlined_call_operand.hbm [shape: f32[32,128], index: 4, kind: input, shape index: {}]   ;;  %s1601_s5 = inlined_call_operand.vmem [shape: f32[1,128], index: 5, kind: input, shape index: {}]   ;;  %s1602_s6 = inlined_call_operand.hbm [shape: f32[8,32], index: 6, kind: output, shape index: {}]  }
   0x1   :  { %12 = vsyncpa [#allocation7], 0 }
   0x2   :  { %13 = vsyncpa [#allocation5], 0  ;;  %s1373_s21 = smov [#allocation6]   ;;  %s1279_s25 = scalar_lea.hbm %s1598_s2, 256 }
   0x3   :  { %s31_s22 = sshll.u32 %s1373_s21, 4  ;;  %p1280_p0 = scmp.ne.s32.totalorder %s1598_s2, %s1279_s25  ;;  %s32_s22 = int_to_ptr.vmem [resolvable:$true] %s31_s22 }
   0x4   :  { %p1283_p1 = scmp.lt.u32.totalorder %s1279_s25, %s1598_s2 }
   0x6   :  { %p1285_p2 = pnand %p1283_p1, %p1280_p0 }
   0x8   :  { %1288 = shalt.err (!%p1285_p2)
}
   0x9   :  { %s1289_s30 = scalar_lea.vmem %s32_s22, 256  ;;  %p1294_p4 = scmp.lt.s32.totalorder %s32_s22, %s32_s22 }
   0xa   :  { %p1290_p3 = scmp.ne.s32.totalorder %s32_s22, %s1289_s30  ;;  %p1295_p5 = scmp.lt.s32.totalorder %s1289_s30, %s1289_s30 }
   0xc   :  { %p1296_p6 = por %p1295_p5, %p1294_p4 }
   0xe   :  { %p1297_p7 = pnand %p1296_p6, %p1290_p3 }
  0x10   :  { %1300 = shalt.err (!%p1297_p7)
}
  0x11   :  { %s1374_s7 = smov 128   ;;  %s1375_s8 = smov 8  }
  0x12   :  { %37 = dma.hbm_to_vmem [thread:$0]  %s1598_s2, 256, %s32_s22, [#allocation7], %s1374_s7, %s1374_s7, %s1375_s8  }
  0x13   :  { %s1376_s11 = smov [#allocation3]   ;;  %s1377_s13 = smov [#allocation8]  }
  0x14   :  { %s20_s12 = sshll.u32 %s1376_s11, 4  ;;  %s45_s14 = sshll.u32 %s1377_s13, 4  ;;  %s21_s12 = int_to_ptr.vmem [resolvable:$true] %s20_s12  ;;  %s46_s14 = int_to_ptr.vmem [resolvable:$true] %s45_s14 }
  0x15   :  { %s1301_s17 = scalar_lea.hbm %s1596_s0, 128 }
  0x16   :  { %p1302_p8 = scmp.ne.s32.totalorder %s1596_s0, %s1301_s17  ;;  %p1305_p9 = scmp.lt.u32.totalorder %s1301_s17, %s1596_s0 }
  0x18   :  { %p1307_p10 = pnand %p1305_p9, %p1302_p8 }
  0x1a   :  { %1310 = shalt.err (!%p1307_p10)
}
  0x1b   :  { %s1311_s2 = scalar_lea.vmem %s21_s12, 128  ;;  %p1316_p12 = scmp.lt.s32.totalorder %s21_s12, %s21_s12 }
  0x1c   :  { %p1312_p11 = scmp.ne.s32.totalorder %s21_s12, %s1311_s2  ;;  %p1317_p13 = scmp.lt.s32.totalorder %s1311_s2, %s1311_s2 }
  0x1e   :  { %p1318_p0 = por %p1317_p13, %p1316_p12 }
  0x20   :  { %p1319_p1 = pnand %p1318_p0, %p1312_p11 }
  0x22   :  { %1322 = shalt.err (!%p1319_p1)
}
  0x23   :  { %23 = dma.hbm_to_vmem [thread:$0]  %s1596_s0, 128, %s21_s12, [#allocation4]  }
  0x24   :  { %s1323_s26 = scalar_lea.hbm %s1600_s4, 512 }
  0x25   :  { %p1324_p2 = scmp.ne.s32.totalorder %s1600_s4, %s1323_s26  ;;  %p1327_p3 = scmp.lt.u32.totalorder %s1323_s26, %s1600_s4 }
  0x27   :  { %p1329_p4 = pnand %p1327_p3, %p1324_p2 }
  0x29   :  { %1332 = shalt.err (!%p1329_p4)
}
  0x2a   :  { %s1333_s9 = scalar_lea.vmem %s46_s14, 512  ;;  %p1338_p6 = scmp.lt.s32.totalorder %s46_s14, %s46_s14 }
  0x2b   :  { %p1334_p5 = scmp.ne.s32.totalorder %s46_s14, %s1333_s9  ;;  %p1339_p7 = scmp.lt.s32.totalorder %s1333_s9, %s1333_s9 }
  0x2d   :  { %p1340_p8 = por %p1339_p7, %p1338_p6 }
  0x2f   :  { %p1341_p9 = pnand %p1340_p8, %p1334_p5 }
  0x31   :  { %1344 = shalt.err (!%p1341_p9)
}
  0x32   :  { %51 = dma.hbm_to_vmem [thread:$0]  %s1600_s4, 512, %s46_s14, [#allocation7], %s1374_s7, %s1374_s7, %s1375_s8  }
  0x33   :  { %1367 = dma.done.wait [#allocation4], 128  }
  0x34   :  { %1368 = vsyncadd [#allocation4], 4294967168 }
  0x35   :  { %1369 = dma.done.wait [#allocation7], 768  }
  0x36   :  { %1370 = vsyncadd [#allocation7], 4294966528  ;;  %v1378_v0 = vmov 0.0|0.0   ;;  %vm1379_vm0 = vmmov 0   ;;  %v1380_v1 = vmov 0.0   ;;  %v64_v2 = vld [vmem:[#allocation6] sm:$0xff]  ;;  %v253_v31 = vlaneseq }
  0x37   :  { %1168 = vmatprep.subr.bf16.mxu0 %v1378_v0  ;;  %1171 = vmatprep.subr.bf16.mxu1 %v1378_v0  ;;  %v65_v3 = vld [vmem:[#allocation6 + $0x8] sm:$0xff]  ;;  %v148_v4 = vld [vmem:[#allocation8] sm:$0xff]  ;;  %v149_v6 = vld [vmem:[#allocation8 + $0x8] sm:$0xff]  ;;  %vm73_vm1 = vcmask 130048   ;;  %vm155_vm2 = vcmask 261120   ;;  %s1381_s13 = smov 64  }
  0x38   :  { %1077 = vmatprep.mubr.msk.f32.mxu0 %vm1379_vm0, %v1380_v1  ;;  %1088 = vmatprep.mubr.msk.f32.mxu1 %vm1379_vm0, %v1380_v1  ;;  %v1169_v5 = vpack.c.bf16 %v65_v3, %v64_v2  ;;  %v150_v7 = vld [vmem:[#allocation8 + $0x10] sm:$0xff]  ;;  %v1468_v8 = vpack.c.bf16 %v149_v6, %v148_v4  ;;  %v151_v9 = vld [vmem:[#allocation8 + $0x18] sm:$0xff]  ;;  %v63_v10 = vld [vmem:[#allocation3] sm:$0xff]  ;;  %v254_v32 = vshrl.u32 %v253_v31, 7  ;;  %vm266_vm3 = vcmask 253952   ;;  %s1384_s14 = smov [#allocation9]  }
  0x39   :  { %v1471_v11 = vpack.c.bf16 %v151_v9, %v150_v7  ;;  %v153_v12 = vld [vmem:[%s1597_s1] sm:$0x1]  ;;  %s1002_s15 = sshll.u32 %s1384_s14, 4  ;;  %s1003_s15 = int_to_ptr.vmem [resolvable:$true] %s1002_s15 }
  0x3a   :  { %1170 = vmatpush3.bf16.msra.mxu0 %v1169_v5  ;;  %1173 = vmatpush3.bf16.msra.mxu1 %v1468_v8  ;;  %v1012_v13 = vld [vmem:[%s1599_s3] ss:$0 sm:$0xff]  ;;  %v255_v33 = vsub.s32 0, %v254_v32  ;;  %s1382_s3 = smov 96   ;;  %s1345_s16 = scalar_lea.vmem %s1003_s15, 128 }
  0x3b   :  { %1177 = vmatprep.subr.bf16.mxu0 %v1378_v0  ;;  %1174 = vmatprep.subr.bf16.mxu1 %v1378_v0  ;;  %v1499_v17 = vld [vmem:[%s1601_s5] sm:$0x1]  ;;  %s1383_s5 = smov 32   ;;  %p1346_p10 = scmp.ne.s32.totalorder %s1003_s15, %s1345_s16 }
  0x3c   :  { %v256_v35 = vrot.slane %v153_v12, %v255_v33  ;;  %p1350_p11 = scmp.lt.s32.totalorder %s1003_s15, %s1003_s15  ;;  %p1351_p12 = scmp.lt.s32.totalorder %s1345_s16, %s1345_s16 }
  0x3d   :  { %1078 = vmatmul.mubr.msk.f32.vlgmr.msra.gmra.mrb[0].mxu0 %vm73_vm1, %v63_v10 }
  0x3e   :  { %1179 = vmatpush3.bf16.msra.mxu0 %v1468_v8  ;;  %1099 = vmatprep.mubr.msk.f32.mxu0 %vm1379_vm0, %v1380_v1  ;;  %p1352_p13 = por %p1351_p12, %p1350_p11 }
  0x3f   :  { %1176 = vmatpush3.bf16.msra.mxu1 %v1471_v11  ;;  %1180 = vmatprep.subr.bf16.mxu0 %v1378_v0 }
  0x40   :  { %1183 = vmatprep.subr.bf16.mxu1 %v1378_v0  ;;  %p1353_p0 = pnand %p1352_p13, %p1346_p10 }
  0x42   :  { %1089 = vmatmul.mubr.msk.f32.vlgmr.msra.gmra.mrb[0].mxu1 %vm155_vm2, %v153_v12  ;;  %1182 = vmatpush3.bf16.msra.mxu0 %v1471_v11 }
  0x43   :  { %1185 = vmatpush3.bf16.msra.mxu1 %v1468_v8  ;;  %1110 = vmatprep.mubr.msk.f32.mxu1 %vm1379_vm0, %v1380_v1 }
  0x44   :  { %1186 = vmatprep.subr.bf16.mxu1 %v1378_v0  ;;  %1189 = vmatprep.subr.bf16.mxu0 %v1378_v0 }
  0x47   :  { %1188 = vmatpush3.bf16.msra.mxu1 %v1471_v11 }
  0x48   :  { %1195 = vmatprep.subr.bf16.mxu1 %v1378_v0 }
 0x110   :  { %v143_v14 = vpop.f32.mrb[0].mxu0 }
 0x111   :  { %v144_v15 = vadd.f32 %v1012_v13, %v143_v14  ;;  %v1079_v16 = vpop.f32.mrb[1].mxu0 }
 0x113   :  { %147 = vst [vmem:[#allocation2] sm:$0xff] %v144_v15 }
 0x115   :  { %v225_v18 = vpop.f32.mrb[0].mxu1 }
 0x116   :  { %v226_v19 = vadd.f32 %v225_v18, %v1499_v17  ;;  %v1090_v20 = vpop.f32.mrb[1].mxu1 }
 0x118   :  { %237 = vrot.lane.b32.xlu0 %v226_v19, %s1381_s13 }
 0x11a   :  { %v154_v21 = vld [vmem:[#allocation2] sm:$0x1]  ;;  %v268_v46 = vld [vmem:[#allocation2 + $0x1] sm:$0x1]  ;;  %v372_v4 = vld [vmem:[#allocation2 + $0x2] sm:$0x1] }
 0x11b   :  { %v229_v22 = vadd.f32 %v226_v19, %v154_v21 }
 0x11d   :  { %v1015_v23 = vmul.f32 -1.442695, %v229_v22 }
 0x11f   :  { %1231 = vpow2.f32 %v1015_v23 }
 0x129   :  { %v1232_v24 = vpop.eup %1231 }
 0x12a   :  { %v233_v25 = vadd.f32 1.0, %v1232_v24 }
 0x12c   :  { %1233 = vrcp.f32 %v233_v25 }
 0x136   :  { %v1234_v26 = vpop.eup %1233 }
 0x137   :  { %v247_v37 = vsub.f32 1.0, %v1234_v26 }
 0x18a   :  { %v238_v27 = vpop.permute.xlu0 %237 }
 0x18b   :  { %v240_v28 = vmul.f32 %v1234_v26, %v238_v27  ;;  %v476_v27 = vld [vmem:[#allocation2 + $0x3] sm:$0x1] }
 0x18d   :  { %242 = vrot.lane.b32.xlu0 %v240_v28, %s1381_s13 }
 0x1ff   :  { %v243_v29 = vpop.permute.xlu0 %242 }
 0x200   :  { %v245_v30 = vadd.f32 %v243_v29, %v154_v21 }
 0x202   :  { %1235 = vtanh.f32 %v245_v30 }
 0x20c   :  { %v1236_v34 = vpop.eup %1235 }
 0x20d   :  { %249 = vrot.lane.b32.xlu1 %v1236_v34, %s1382_s3 }
 0x211   :  { %257 = vrot.lane.b32.xlu1 %v256_v35, %s1383_s5 }
 0x27f   :  { %v250_v36 = vpop.permute.xlu1 %249 }
 0x280   :  { %v252_v39 = vmul.f32 %v250_v36, %v247_v37 }
 0x283   :  { %v258_v38 = vpop.permute.xlu1 %257 }
 0x284   :  { %v260_v40 = vmul.f32 %v1234_v26, %v258_v38 }
 0x286   :  { %v261_v41 = vadd.f32 %v260_v40, %v252_v39 }
 0x288   :  { %263 = vrot.lane.b32.xlu0 %v261_v41, %s1382_s3 }
 0x2fa   :  { %v264_v42 = vpop.permute.xlu0 %263 }
 0x2fb   :  { %267 = vst.msk [vmem:[#allocation9] sm:$0x1] %vm266_vm3, %v264_v42  ;;  %1100 = vmatmul.mubr.msk.f32.vlgmr.msra.gmra.mrb[2].mxu0 %vm155_vm2, %v264_v42 }
 0x2fc   :  { %1191 = vmatpush3.bf16.msra.mxu0 %v1468_v8  ;;  %1121 = vmatprep.mubr.msk.f32.mxu0 %vm1379_vm0, %v1380_v1 }
 0x2fd   :  { %1192 = vmatprep.subr.bf16.mxu0 %v1378_v0 }
 0x300   :  { %1194 = vmatpush3.bf16.msra.mxu0 %v1471_v11 }
 0x301   :  { %1201 = vmatprep.subr.bf16.mxu0 %v1378_v0 }
 0x3ce   :  { %v337_v43 = vpop.f32.mrb[2].mxu0 }
 0x3cf   :  { %v338_v44 = vadd.f32 %v337_v43, %v1499_v17  ;;  %v1101_v45 = vpop.f32.mrb[3].mxu0 }
 0x3d1   :  { %349 = vrot.lane.b32.xlu1 %v338_v44, %s1381_s13  ;;  %v341_v47 = vadd.f32 %v338_v44, %v268_v46 }
 0x3d3   :  { %v1017_v48 = vmul.f32 -1.442695, %v341_v47  ;;  %v580_v47 = vld [vmem:[#allocation2 + $0x4] sm:$0x1] }
 0x3d5   :  { %1237 = vpow2.f32 %v1017_v48 }
 0x3df   :  { %v1238_v49 = vpop.eup %1237 }
 0x3e0   :  { %v345_v50 = vadd.f32 1.0, %v1238_v49 }
 0x3e2   :  { %1239 = vrcp.f32 %v345_v50 }
 0x3ec   :  { %v1240_v51 = vpop.eup %1239 }
 0x3ed   :  { %v359_v57 = vsub.f32 1.0, %v1240_v51  ;;  %v365_v59 = vmul.f32 %v1240_v51, %v261_v41 }
 0x443   :  { %v350_v52 = vpop.permute.xlu1 %349 }
 0x444   :  { %v352_v53 = vmul.f32 %v1240_v51, %v350_v52 }
 0x446   :  { %354 = vrot.lane.b32.xlu0 %v352_v53, %s1381_s13 }
 0x4b8   :  { %v355_v54 = vpop.permute.xlu0 %354 }
 0x4b9   :  { %v357_v55 = vadd.f32 %v355_v54, %v268_v46 }
 0x4bb   :  { %1241 = vtanh.f32 %v357_v55 }
 0x4c5   :  { %v1242_v56 = vpop.eup %1241 }
 0x4c6   :  { %361 = vrot.lane.b32.xlu1 %v1242_v56, %s1382_s3 }
 0x538   :  { %v362_v58 = vpop.permute.xlu1 %361 }
 0x539   :  { %v364_v60 = vmul.f32 %v362_v58, %v359_v57 }
 0x53b   :  { %v366_v61 = vadd.f32 %v365_v59, %v364_v60 }
 0x53d   :  { %368 = vrot.lane.b32.xlu0 %v366_v61, %s1382_s3 }
 0x5af   :  { %v369_v62 = vpop.permute.xlu0 %368 }
 0x5b0   :  { %371 = vst.msk [vmem:[#allocation9 + $0x1] sm:$0x1] %vm266_vm3, %v369_v62  ;;  %1111 = vmatmul.mubr.msk.f32.vlgmr.msra.gmra.mrb[2].mxu1 %vm155_vm2, %v369_v62 }
 0x5b1   :  { %1197 = vmatpush3.bf16.msra.mxu1 %v1468_v8  ;;  %1132 = vmatprep.mubr.msk.f32.mxu1 %vm1379_vm0, %v1380_v1 }
 0x5b2   :  { %1198 = vmatprep.subr.bf16.mxu1 %v1378_v0 }
 0x5b5   :  { %1200 = vmatpush3.bf16.msra.mxu1 %v1471_v11 }
 0x5b6   :  { %1207 = vmatprep.subr.bf16.mxu1 %v1378_v0 }
 0x683   :  { %v441_v63 = vpop.f32.mrb[2].mxu1 }
 0x684   :  { %v442_v2 = vadd.f32 %v441_v63, %v1499_v17  ;;  %v1112_v3 = vpop.f32.mrb[3].mxu1 }
 0x686   :  { %453 = vrot.lane.b32.xlu1 %v442_v2, %s1381_s13  ;;  %v445_v5 = vadd.f32 %v442_v2, %v372_v4 }
 0x688   :  { %v1019_v6 = vmul.f32 -1.442695, %v445_v5  ;;  %v684_v5 = vld [vmem:[#allocation2 + $0x5] sm:$0x1] }
 0x68a   :  { %1243 = vpow2.f32 %v1019_v6 }
 0x694   :  { %v1244_v7 = vpop.eup %1243 }
 0x695   :  { %v449_v9 = vadd.f32 1.0, %v1244_v7 }
 0x697   :  { %1245 = vrcp.f32 %v449_v9 }
 0x6a1   :  { %v1246_v10 = vpop.eup %1245 }
 0x6a2   :  { %v463_v18 = vsub.f32 1.0, %v1246_v10  ;;  %v469_v20 = vmul.f32 %v1246_v10, %v366_v61 }
 0x6f8   :  { %v454_v12 = vpop.permute.xlu1 %453 }
 0x6f9   :  { %v456_v13 = vmul.f32 %v1246_v10, %v454_v12 }
 0x6fb   :  { %458 = vrot.lane.b32.xlu0 %v456_v13, %s1381_s13 }
 0x76d   :  { %v459_v14 = vpop.permute.xlu0 %458 }
 0x76e   :  { %v461_v15 = vadd.f32 %v459_v14, %v372_v4 }
 0x770   :  { %1247 = vtanh.f32 %v461_v15 }
 0x77a   :  { %v1248_v16 = vpop.eup %1247 }
 0x77b   :  { %465 = vrot.lane.b32.xlu1 %v1248_v16, %s1382_s3 }
 0x7ed   :  { %v466_v19 = vpop.permute.xlu1 %465 }
 0x7ee   :  { %v468_v21 = vmul.f32 %v466_v19, %v463_v18 }
 0x7f0   :  { %v470_v22 = vadd.f32 %v469_v20, %v468_v21 }
 0x7f2   :  { %472 = vrot.lane.b32.xlu0 %v470_v22, %s1382_s3 }
 0x864   :  { %v473_v23 = vpop.permute.xlu0 %472 }
 0x865   :  { %475 = vst.msk [vmem:[#allocation9 + $0x2] sm:$0x1] %vm266_vm3, %v473_v23  ;;  %1122 = vmatmul.mubr.msk.f32.vlgmr.msra.gmra.mrb[4].mxu0 %vm155_vm2, %v473_v23 }
 0x866   :  { %1203 = vmatpush3.bf16.msra.mxu0 %v1468_v8  ;;  %1143 = vmatprep.mubr.msk.f32.mxu0 %vm1379_vm0, %v1380_v1 }
 0x867   :  { %1204 = vmatprep.subr.bf16.mxu0 %v1378_v0 }
 0x86a   :  { %1206 = vmatpush3.bf16.msra.mxu0 %v1471_v11 }
 0x86b   :  { %1213 = vmatprep.subr.bf16.mxu0 %v1378_v0 }
 0x938   :  { %v545_v24 = vpop.f32.mrb[4].mxu0 }
 0x939   :  { %v546_v25 = vadd.f32 %v545_v24, %v1499_v17  ;;  %v1123_v26 = vpop.f32.mrb[5].mxu0  ;;  %v788_v24 = vld [vmem:[#allocation2 + $0x6] sm:$0x1] }
 0x93b   :  { %557 = vrot.lane.b32.xlu1 %v546_v25, %s1381_s13  ;;  %v549_v28 = vadd.f32 %v546_v25, %v476_v27 }
 0x93d   :  { %v1021_v29 = vmul.f32 -1.442695, %v549_v28 }
 0x93f   :  { %1249 = vpow2.f32 %v1021_v29 }
 0x949   :  { %v1250_v30 = vpop.eup %1249 }
 0x94a   :  { %v553_v31 = vadd.f32 1.0, %v1250_v30 }
 0x94c   :  { %1251 = vrcp.f32 %v553_v31 }
 0x956   :  { %v1252_v32 = vpop.eup %1251 }
 0x957   :  { %v567_v38 = vsub.f32 1.0, %v1252_v32  ;;  %v573_v40 = vmul.f32 %v1252_v32, %v470_v22 }
 0x9ad   :  { %v558_v33 = vpop.permute.xlu1 %557 }
 0x9ae   :  { %v560_v34 = vmul.f32 %v1252_v32, %v558_v33 }
 0x9b0   :  { %562 = vrot.lane.b32.xlu0 %v560_v34, %s1381_s13 }
 0xa22   :  { %v563_v35 = vpop.permute.xlu0 %562 }
 0xa23   :  { %v565_v36 = vadd.f32 %v563_v35, %v476_v27 }
 0xa25   :  { %1253 = vtanh.f32 %v565_v36 }
 0xa2f   :  { %v1254_v37 = vpop.eup %1253 }
 0xa30   :  { %569 = vrot.lane.b32.xlu1 %v1254_v37, %s1382_s3 }
 0xaa2   :  { %v570_v39 = vpop.permute.xlu1 %569 }
 0xaa3   :  { %v572_v41 = vmul.f32 %v570_v39, %v567_v38 }
 0xaa5   :  { %v574_v42 = vadd.f32 %v573_v40, %v572_v41 }
 0xaa7   :  { %576 = vrot.lane.b32.xlu0 %v574_v42, %s1382_s3 }
 0xb19   :  { %v577_v43 = vpop.permute.xlu0 %576 }
 0xb1a   :  { %579 = vst.msk [vmem:[#allocation9 + $0x3] sm:$0x1] %vm266_vm3, %v577_v43  ;;  %1133 = vmatmul.mubr.msk.f32.vlgmr.msra.gmra.mrb[4].mxu1 %vm155_vm2, %v577_v43 }
 0xb1b   :  { %1209 = vmatpush3.bf16.msra.mxu1 %v1468_v8  ;;  %1154 = vmatprep.mubr.msk.f32.mxu1 %vm1379_vm0, %v1380_v1 }
 0xb1c   :  { %1210 = vmatprep.subr.bf16.mxu1 %v1378_v0 }
 0xb1f   :  { %1212 = vmatpush3.bf16.msra.mxu1 %v1471_v11 }
 0xbed   :  { %v649_v44 = vpop.f32.mrb[4].mxu1 }
 0xbee   :  { %v650_v45 = vadd.f32 %v649_v44, %v1499_v17  ;;  %v1134_v46 = vpop.f32.mrb[5].mxu1  ;;  %v892_v44 = vld [vmem:[#allocation2 + $0x7] sm:$0x1] }
 0xbf0   :  { %661 = vrot.lane.b32.xlu1 %v650_v45, %s1381_s13  ;;  %v653_v48 = vadd.f32 %v650_v45, %v580_v47 }
 0xbf2   :  { %v1023_v49 = vmul.f32 -1.442695, %v653_v48 }
 0xbf4   :  { %1255 = vpow2.f32 %v1023_v49 }
 0xbfe   :  { %v1256_v50 = vpop.eup %1255 }
 0xbff   :  { %v657_v51 = vadd.f32 1.0, %v1256_v50 }
 0xc01   :  { %1257 = vrcp.f32 %v657_v51 }
 0xc0b   :  { %v1258_v52 = vpop.eup %1257 }
 0xc0c   :  { %v671_v58 = vsub.f32 1.0, %v1258_v52  ;;  %v677_v60 = vmul.f32 %v1258_v52, %v574_v42 }
 0xc62   :  { %v662_v53 = vpop.permute.xlu1 %661 }
 0xc63   :  { %v664_v54 = vmul.f32 %v1258_v52, %v662_v53 }
 0xc65   :  { %666 = vrot.lane.b32.xlu0 %v664_v54, %s1381_s13 }
 0xcd7   :  { %v667_v55 = vpop.permute.xlu0 %666 }
 0xcd8   :  { %v669_v56 = vadd.f32 %v667_v55, %v580_v47 }
 0xcda   :  { %1259 = vtanh.f32 %v669_v56 }
 0xce4   :  { %v1260_v57 = vpop.eup %1259 }
 0xce5   :  { %673 = vrot.lane.b32.xlu1 %v1260_v57, %s1382_s3 }
 0xd57   :  { %v674_v59 = vpop.permute.xlu1 %673 }
 0xd58   :  { %v676_v61 = vmul.f32 %v674_v59, %v671_v58 }
 0xd5a   :  { %v678_v62 = vadd.f32 %v677_v60, %v676_v61 }
 0xd5c   :  { %680 = vrot.lane.b32.xlu0 %v678_v62, %s1382_s3 }
 0xdce   :  { %v681_v63 = vpop.permute.xlu0 %680 }
 0xdcf   :  { %683 = vst.msk [vmem:[#allocation9 + $0x4] sm:$0x1] %vm266_vm3, %v681_v63  ;;  %1144 = vmatmul.mubr.msk.f32.vlgmr.msra.gmra.mrb[6].mxu0 %vm155_vm2, %v681_v63 }
 0xdd0   :  { %1215 = vmatpush3.bf16.msra.mxu0 %v1468_v8  ;;  %1165 = vmatprep.mubr.msk.f32.mxu0 %vm1379_vm0, %v1380_v1 }
 0xdd1   :  { %1216 = vmatprep.subr.bf16.mxu0 %v1378_v0 }
 0xdd4   :  { %1218 = vmatpush3.bf16.msra.mxu0 %v1471_v11 }
 0xea2   :  { %v753_v2 = vpop.f32.mrb[6].mxu0 }
 0xea3   :  { %v754_v3 = vadd.f32 %v753_v2, %v1499_v17  ;;  %v1145_v4 = vpop.f32.mrb[7].mxu0 }
 0xea5   :  { %765 = vrot.lane.b32.xlu1 %v754_v3, %s1381_s13  ;;  %v757_v6 = vadd.f32 %v754_v3, %v684_v5 }
 0xea7   :  { %v1025_v7 = vmul.f32 -1.442695, %v757_v6 }
 0xea9   :  { %1261 = vpow2.f32 %v1025_v7 }
 0xeb3   :  { %v1262_v9 = vpop.eup %1261 }
 0xeb4   :  { %v761_v10 = vadd.f32 1.0, %v1262_v9 }
 0xeb6   :  { %1263 = vrcp.f32 %v761_v10 }
 0xec0   :  { %v1264_v8 = vpop.eup %1263 }
 0xec1   :  { %v775_v14 = vsub.f32 1.0, %v1264_v8  ;;  %v781_v16 = vmul.f32 %v1264_v8, %v678_v62 }
 0xf17   :  { %v766_v12 = vpop.permute.xlu1 %765 }
 0xf18   :  { %v768_v1 = vmul.f32 %v1264_v8, %v766_v12 }
 0xf1a   :  { %770 = vrot.lane.b32.xlu0 %v768_v1, %s1381_s13 }
 0xf8c   :  { %v771_v0 = vpop.permute.xlu0 %770 }
 0xf8d   :  { %v773_v11 = vadd.f32 %v771_v0, %v684_v5 }
 0xf8f   :  { %1265 = vtanh.f32 %v773_v11 }
 0xf99   :  { %v1266_v13 = vpop.eup %1265 }
 0xf9a   :  { %777 = vrot.lane.b32.xlu1 %v1266_v13, %s1382_s3 }
0x100c   :  { %v778_v15 = vpop.permute.xlu1 %777 }
0x100d   :  { %v780_v18 = vmul.f32 %v778_v15, %v775_v14 }
0x100f   :  { %v782_v19 = vadd.f32 %v781_v16, %v780_v18 }
0x1011   :  { %784 = vrot.lane.b32.xlu0 %v782_v19, %s1382_s3 }
0x1083   :  { %v785_v20 = vpop.permute.xlu0 %784 }
0x1084   :  { %787 = vst.msk [vmem:[#allocation9 + $0x5] sm:$0x1] %vm266_vm3, %v785_v20  ;;  %1155 = vmatmul.mubr.msk.f32.vlgmr.msra.gmra.mrb[6].mxu1 %vm155_vm2, %v785_v20 }
0x1157   :  { %v857_v21 = vpop.f32.mrb[6].mxu1 }
0x1158   :  { %v858_v22 = vadd.f32 %v857_v21, %v1499_v17  ;;  %v1156_v23 = vpop.f32.mrb[7].mxu1 }
0x115a   :  { %869 = vrot.lane.b32.xlu1 %v858_v22, %s1381_s13  ;;  %v861_v25 = vadd.f32 %v858_v22, %v788_v24 }
0x115c   :  { %v1027_v26 = vmul.f32 -1.442695, %v861_v25 }
0x115e   :  { %1267 = vpow2.f32 %v1027_v26 }
0x1168   :  { %v1268_v27 = vpop.eup %1267 }
0x1169   :  { %v865_v28 = vadd.f32 1.0, %v1268_v27 }
0x116b   :  { %1269 = vrcp.f32 %v865_v28 }
0x1175   :  { %v1270_v29 = vpop.eup %1269 }
0x1176   :  { %v879_v35 = vsub.f32 1.0, %v1270_v29  ;;  %v885_v37 = vmul.f32 %v1270_v29, %v782_v19 }
0x11cc   :  { %v870_v30 = vpop.permute.xlu1 %869 }
0x11cd   :  { %v872_v31 = vmul.f32 %v1270_v29, %v870_v30 }
0x11cf   :  { %874 = vrot.lane.b32.xlu0 %v872_v31, %s1381_s13 }
0x1241   :  { %v875_v32 = vpop.permute.xlu0 %874 }
0x1242   :  { %v877_v33 = vadd.f32 %v875_v32, %v788_v24 }
0x1244   :  { %1271 = vtanh.f32 %v877_v33 }
0x124e   :  { %v1272_v34 = vpop.eup %1271 }
0x124f   :  { %881 = vrot.lane.b32.xlu1 %v1272_v34, %s1382_s3 }
0x12c1   :  { %v882_v36 = vpop.permute.xlu1 %881 }
0x12c2   :  { %v884_v38 = vmul.f32 %v882_v36, %v879_v35 }
0x12c4   :  { %v886_v39 = vadd.f32 %v885_v37, %v884_v38 }
0x12c6   :  { %888 = vrot.lane.b32.xlu0 %v886_v39, %s1382_s3 }
0x1338   :  { %v889_v40 = vpop.permute.xlu0 %888 }
0x1339   :  { %891 = vst.msk [vmem:[#allocation9 + $0x6] sm:$0x1] %vm266_vm3, %v889_v40  ;;  %1166 = vmatmul.mubr.msk.f32.vlgmr.msra.gmra.mrb[8].mxu0 %vm155_vm2, %v889_v40 }
0x140c   :  { %v961_v41 = vpop.f32.mrb[8].mxu0 }
0x140d   :  { %v962_v42 = vadd.f32 %v961_v41, %v1499_v17  ;;  %v1167_v43 = vpop.f32.mrb[9].mxu0 }
0x140f   :  { %973 = vrot.lane.b32.xlu1 %v962_v42, %s1381_s13  ;;  %v965_v45 = vadd.f32 %v962_v42, %v892_v44 }
0x1411   :  { %v1029_v46 = vmul.f32 -1.442695, %v965_v45 }
0x1413   :  { %1273 = vpow2.f32 %v1029_v46 }
0x141d   :  { %v1274_v47 = vpop.eup %1273 }
0x141e   :  { %v969_v48 = vadd.f32 1.0, %v1274_v47 }
0x1420   :  { %1275 = vrcp.f32 %v969_v48 }
0x142a   :  { %v1276_v49 = vpop.eup %1275 }
0x142b   :  { %v983_v17 = vsub.f32 1.0, %v1276_v49  ;;  %v989_v56 = vmul.f32 %v1276_v49, %v886_v39 }
0x1481   :  { %v974_v50 = vpop.permute.xlu1 %973 }
0x1482   :  { %v976_v51 = vmul.f32 %v1276_v49, %v974_v50 }
0x1484   :  { %978 = vrot.lane.b32.xlu0 %v976_v51, %s1381_s13 }
0x14f6   :  { %v979_v52 = vpop.permute.xlu0 %978 }
0x14f7   :  { %v981_v53 = vadd.f32 %v979_v52, %v892_v44 }
0x14f9   :  { %1277 = vtanh.f32 %v981_v53 }
0x1503   :  { %v1278_v54 = vpop.eup %1277 }
0x1504   :  { %985 = vrot.lane.b32.xlu1 %v1278_v54, %s1382_s3 }
0x1576   :  { %v986_v55 = vpop.permute.xlu1 %985 }
0x1577   :  { %v988_v57 = vmul.f32 %v986_v55, %v983_v17 }
0x1579   :  { %v990_v58 = vadd.f32 %v989_v56, %v988_v57 }
0x157b   :  { %992 = vrot.lane.b32.xlu0 %v990_v58, %s1382_s3 }
0x15ed   :  { %v993_v59 = vpop.permute.xlu0 %992 }
0x15ee   :  { %995 = vst.msk [vmem:[#allocation9 + $0x7] sm:$0x1] %vm266_vm3, %v993_v59 }
0x15ef   :  { %1356 = shalt.err (!%p1353_p0)
}
0x15f0   :  { %s1357_s19 = scalar_lea.hbm %s1602_s6, 128 }
0x15f1   :  { %p1358_p1 = scmp.ne.s32.totalorder %s1602_s6, %s1357_s19  ;;  %p1361_p2 = scmp.lt.u32.totalorder %s1357_s19, %s1602_s6 }
0x15f3   :  { %p1363_p3 = pnand %p1361_p2, %p1358_p1 }
0x15f5   :  { %1366 = shalt.err (!%p1363_p3)
}
0x15f6   :  { %1005 = dma.vmem_to_hbm [thread:$0]  %s1003_s15, 128, %s1602_s6, [#allocation5]  }
0x15f7   :  { %1371 = dma.done.wait [#allocation5], 128  }
0x15f8   :  { %1372 = vsyncadd [#allocation5], 4294967168 }
0x15f9   :  { %1009 = vsyncpa [#allocation4], 1 }
0x15fa   :  { %1010 = vsyncpa [#allocation7], 1 }
0x15fb   :  { %1011 = vsyncpa [#allocation5], 1 }

</bundles_post_ra>
